<compile_context>
chip_gen: v7x
topology: tpu7x:2x2x1
jax: 0.10.0
libtpu: 0.0.40
codegen_flags: <defaults>
</compile_context>

<pallas_src>
import functools

import jax
import jax.numpy as jnp
from jax.experimental import pallas as pl
from jax.experimental.pallas import tpu as pltpu


def _round_up(n, m):
    return ((n + m - 1) // m) * m


def _categorical_kernel(x_ref, w1_ref, b1_ref, w2_ref, b2_ref, w3_ref, b3_ref,
                        s_ref, o_ref):
    # ---- MLP trunk: bf16 MXU matmuls, f32 accumulate, f32 epilogue ----
    h1 = jnp.dot(x_ref[...], w1_ref[...],
                 preferred_element_type=jnp.float32) + b1_ref[...]
    h1 = jnp.maximum(h1, 0.0)

    h2 = jnp.dot(h1.astype(jnp.bfloat16), w2_ref[...],
                 preferred_element_type=jnp.float32) + b2_ref[...]
    h2 = jnp.maximum(h2, 0.0)

    logits = jnp.dot(h2.astype(jnp.bfloat16), w3_ref[...],
                     preferred_element_type=jnp.float32) + b3_ref[...]

    # ---- Segmented softmax over the atom groups ----
    # Single row-global max: the subtracted constant cancels within each
    # segment's softmax, so per-segment maxima are unnecessary (1 XLU reduce
    # instead of num_actions reduces + selects).
    m = jnp.max(logits, axis=-1, keepdims=True)
    e = jnp.exp(logits - m)

    # Segment sum + broadcast-back in one MXU matmul against the constant
    # block-diagonal ones matrix S (bf16 operands, f32 accumulation).
    s_full = jnp.dot(e.astype(jnp.bfloat16), s_ref[...],
                     preferred_element_type=jnp.float32)

    o_ref[...] = (e * pl.reciprocal(s_full, approx=True)).astype(o_ref.dtype)


def categorical_network_forward(x, params, num_actions, num_atoms,
                                tile_b=1024, out_dtype=jnp.float32):
    """x: (B, input_size) float32; params: dict of W1,b1,W2,b2,W3,b3 (f32)."""
    B, input_size = x.shape
    layer_size = params["W1"].shape[1]
    out_dim = num_actions * num_atoms
    # NOTE: out_dim = 4*32 = 128 here is exactly one vreg wide (lane-dense).
    # TODO(synk): if num_actions*num_atoms is ever not a multiple of 128, pad
    # the kernel output lane dim to the next multiple of 128 and slice here.

    # Balanced batch tiles, multiples of 16 (bf16 packs 16 sublanes per vreg).
    # On v7x force >=2 grid steps (when B >= 32) so the "parallel" batch axis
    # can be sharded across its two TensorCores; no-op on v5e/v6e.
    min_steps = 1
    try:
        if "v7" in jax.devices()[0].device_kind.lower() and B >= 32:
            min_steps = 2
    except Exception:  # pragma: no cover - device query best-effort only
        pass
    n_steps = max(min_steps, pl.cdiv(B, tile_b))
    tb = _round_up(pl.cdiv(B, n_steps), 16)
    bp = n_steps * tb
    if bp != B:
        x = jnp.pad(x, ((0, bp - B), (0, 0)))

    # bf16 operands for the MXU; biases stay f32 (f32 accumulate in-kernel).
    x_bf = x.astype(jnp.bfloat16)
    w1 = params["W1"].astype(jnp.bfloat16)
    w2 = params["W2"].astype(jnp.bfloat16)
    w3 = params["W3"].astype(jnp.bfloat16)
    b1, b2, b3 = params["b1"], params["b2"], params["b3"]

    # Constant block-diagonal ones matrix: S[i, j] = 1 iff i, j in same atom
    # segment. e @ S both sums each segment and broadcasts the sum back.
    seg = jnp.arange(out_dim, dtype=jnp.int32) // num_atoms
    s_mat = (seg[:, None] == seg[None, :]).astype(jnp.bfloat16)

    grid = (n_steps,)

    def resident(arr):  # weights/biases/S: same block every step -> resident
        return pl.BlockSpec(arr.shape, lambda i: (0, 0))

    flops = 2 * bp * (input_size * layer_size
                      + layer_size * layer_size
                      + layer_size * out_dim
                      + out_dim * out_dim)        # segment-sum matmul
    bytes_accessed = (x_bf.size * 2 + w1.size * 2 + w2.size * 2 + w3.size * 2
                      + s_mat.size * 2
                      + (b1.size + b2.size + b3.size) * 4
                      + bp * out_dim * jnp.dtype(out_dtype).itemsize)
    cost = pl.CostEstimate(flops=flops,
                           transcendentals=2 * bp * out_dim,   # exp + recip
                           bytes_accessed=bytes_accessed)

    flat = pl.pallas_call(
        _categorical_kernel,
        out_shape=jax.ShapeDtypeStruct((bp, out_dim), out_dtype),
        grid=grid,
        in_specs=[
            pl.BlockSpec((tb, input_size), lambda i: (i, 0)),   # x: streamed
            resident(w1), resident(b1),
            resident(w2), resident(b2),
            resident(w3), resident(b3),
            resident(s_mat),
        ],
        out_specs=pl.BlockSpec((tb, out_dim), lambda i: (i, 0)),
        compiler_params=pltpu.CompilerParams(
            dimension_semantics=("parallel",)),
        cost_estimate=cost,
    )(x_bf, w1, b1, w2, b2, w3, b3, s_mat)

    return flat[:B].reshape(B, num_actions, num_atoms)


def init_params(key, input_size, num_actions, num_atoms, layer_size=128):
    """Deterministic synthetic init (Kaiming-uniform-ish like nn.Linear)."""
    ks = jax.random.split(key, 6)

    def linear(kw, kb, fan_in, fan_out):
        bound = 1.0 / jnp.sqrt(float(fan_in))
        W = jax.random.uniform(kw, (fan_in, fan_out), jnp.float32, -bound, bound)
        b = jax.random.uniform(kb, (1, fan_out), jnp.float32, -bound, bound)
        return W, b

    W1, b1 = linear(ks[0], ks[1], input_size, layer_size)
    W2, b2 = linear(ks[2], ks[3], layer_size, layer_size)
    W3, b3 = linear(ks[4], ks[5], layer_size, num_actions * num_atoms)
    return {"W1": W1, "b1": b1, "W2": W2, "b2": b2, "W3": W3, "b3": b3}


def reference_forward(x, params, num_actions, num_atoms):
    h1 = jnp.maximum(x @ params["W1"] + params["b1"], 0.0)
    h2 = jnp.maximum(h1 @ params["W2"] + params["b2"], 0.0)
    z = (h2 @ params["W3"] + params["b3"]).reshape(x.shape[0], num_actions, num_atoms)
    return jax.nn.softmax(z, axis=-1)


if __name__ == "__main__":
    input_size = 32
    layer_size = 128
    num_actions = 4
    num_atoms = 32

    key = jax.random.PRNGKey(0)
    k_x, k_p, k_x2 = jax.random.split(key, 3)
    params = init_params(k_p, input_size, num_actions, num_atoms, layer_size)

    # Case 1: tiny batch, single grid step (tb rounds up to 16, padded rows).
    batch = 8
    x = jax.random.normal(k_x, (batch, input_size), jnp.float32)
    out = jax.block_until_ready(
        categorical_network_forward(x, params, num_actions, num_atoms))
    ref = jax.block_until_ready(
        reference_forward(x, params, num_actions, num_atoms))
    assert out.shape == (batch, num_actions, num_atoms)
    assert not bool(jnp.any(jnp.isnan(out)))
    # bf16 MXU operands + bf16 segment-sum + approx reciprocal -> loosened
    # tolerance vs the f32 reference.
    assert float(jnp.max(jnp.abs(out - ref))) < 2e-2
    assert jnp.allclose(jnp.sum(out, axis=-1), 1.0, atol=1e-2)

    # Case 2: exercise the balanced batch grid + padding (B=40, tile_b=16 ->
    # 3 grid steps of 16 rows, 48 padded total).
    batch2 = 40
    x2 = jax.random.normal(k_x2, (batch2, input_size), jnp.float32)
    out2 = jax.block_until_ready(
        categorical_network_forward(x2, params, num_actions, num_atoms,
                                    tile_b=16))
    ref2 = jax.block_until_ready(
        reference_forward(x2, params, num_actions, num_atoms))
    assert out2.shape == (batch2, num_actions, num_atoms)
    assert not bool(jnp.any(jnp.isnan(out2)))
    assert float(jnp.max(jnp.abs(out2 - ref2))) < 2e-2
    assert jnp.allclose(jnp.sum(out2, axis=-1), 1.0, atol=1e-2)

    print("KERNEL_OK")
</pallas_src>

<mosaic_0001>
module attributes {stable_mosaic.version = 11 : i64} {
  func.func @_categorical_kernel(%arg0: i32, %arg1: memref<16x32xbf16, #tpu.memory_space<vmem>>, %arg2: memref<32x128xbf16, #tpu.memory_space<vmem>>, %arg3: memref<1x128xf32, #tpu.memory_space<vmem>>, %arg4: memref<128x128xbf16, #tpu.memory_space<vmem>>, %arg5: memref<1x128xf32, #tpu.memory_space<vmem>>, %arg6: memref<128x128xbf16, #tpu.memory_space<vmem>>, %arg7: memref<1x128xf32, #tpu.memory_space<vmem>>, %arg8: memref<128x128xbf16, #tpu.memory_space<vmem>>, %arg9: memref<16x128xf32, #tpu.memory_space<vmem>>) attributes {dimension_semantics = [#tpu.dimension_semantics<parallel>], iteration_bounds = array<i64: 1>, scalar_prefetch = 0 : i64, scratch_operands = 0 : i64, tpu.core_type = #tpu.core_type<tc>, window_params = [{transform_indices = @transform_0, window_bounds = array<i64: 16, 32>}, {pipeline_mode = #tpu.pipeline_mode<synchronous>, transform_indices = @transform_1, window_bounds = array<i64: 32, 128>}, {pipeline_mode = #tpu.pipeline_mode<synchronous>, transform_indices = @transform_2, window_bounds = array<i64: 1, 128>}, {pipeline_mode = #tpu.pipeline_mode<synchronous>, transform_indices = @transform_3, window_bounds = array<i64: 128, 128>}, {pipeline_mode = #tpu.pipeline_mode<synchronous>, transform_indices = @transform_4, window_bounds = array<i64: 1, 128>}, {pipeline_mode = #tpu.pipeline_mode<synchronous>, transform_indices = @transform_5, window_bounds = array<i64: 128, 128>}, {pipeline_mode = #tpu.pipeline_mode<synchronous>, transform_indices = @transform_6, window_bounds = array<i64: 1, 128>}, {pipeline_mode = #tpu.pipeline_mode<synchronous>, transform_indices = @transform_7, window_bounds = array<i64: 128, 128>}, {transform_indices = @transform_8, window_bounds = array<i64: 16, 128>}]} {
    %c0 = arith.constant 0 : index
    %c0_0 = arith.constant 0 : index
    %0 = vector.load %arg1[%c0, %c0_0] : memref<16x32xbf16, #tpu.memory_space<vmem>>, vector<16x32xbf16>
    %c0_1 = arith.constant 0 : index
    %c0_2 = arith.constant 0 : index
    %1 = vector.load %arg2[%c0_1, %c0_2] : memref<32x128xbf16, #tpu.memory_space<vmem>>, vector<32x128xbf16>
    %cst = arith.constant dense<0.000000e+00> : vector<16x128xf32>
    %2 = tpu.matmul %0, %1, %cst {dimension_numbers = #tpu.dot_dimension_numbers<[1], [0], [0], [1], [0, 0, 1, 1], [], []>} : vector<16x32xbf16>, vector<32x128xbf16>, vector<16x128xf32> -> vector<16x128xf32>
    %c0_3 = arith.constant 0 : index
    %c0_4 = arith.constant 0 : index
    %3 = vector.load %arg3[%c0_3, %c0_4] : memref<1x128xf32, #tpu.memory_space<vmem>>, vector<1x128xf32>
    %4 = vector.broadcast %3 : vector<1x128xf32> to vector<16x128xf32>
    %5 = arith.addf %2, %4 : vector<16x128xf32>
    %cst_5 = arith.constant 0.000000e+00 : f32
    %6 = vector.broadcast %cst_5 : f32 to vector<16x128xf32>
    %7 = arith.maximumf %5, %6 : vector<16x128xf32>
    %8 = arith.truncf %7 : vector<16x128xf32> to vector<16x128xbf16>
    %c0_6 = arith.constant 0 : index
    %c0_7 = arith.constant 0 : index
    %9 = vector.load %arg4[%c0_6, %c0_7] : memref<128x128xbf16, #tpu.memory_space<vmem>>, vector<128x128xbf16>
    %cst_8 = arith.constant dense<0.000000e+00> : vector<16x128xf32>
    %10 = tpu.matmul %8, %9, %cst_8 {dimension_numbers = #tpu.dot_dimension_numbers<[1], [0], [0], [1], [0, 0, 1, 1], [], []>} : vector<16x128xbf16>, vector<128x128xbf16>, vector<16x128xf32> -> vector<16x128xf32>
    %c0_9 = arith.constant 0 : index
    %c0_10 = arith.constant 0 : index
    %11 = vector.load %arg5[%c0_9, %c0_10] : memref<1x128xf32, #tpu.memory_space<vmem>>, vector<1x128xf32>
    %12 = vector.broadcast %11 : vector<1x128xf32> to vector<16x128xf32>
    %13 = arith.addf %10, %12 : vector<16x128xf32>
    %cst_11 = arith.constant 0.000000e+00 : f32
    %14 = vector.broadcast %cst_11 : f32 to vector<16x128xf32>
    %15 = arith.maximumf %13, %14 : vector<16x128xf32>
    %16 = arith.truncf %15 : vector<16x128xf32> to vector<16x128xbf16>
    %c0_12 = arith.constant 0 : index
    %c0_13 = arith.constant 0 : index
    %17 = vector.load %arg6[%c0_12, %c0_13] : memref<128x128xbf16, #tpu.memory_space<vmem>>, vector<128x128xbf16>
    %cst_14 = arith.constant dense<0.000000e+00> : vector<16x128xf32>
    %18 = tpu.matmul %16, %17, %cst_14 {dimension_numbers = #tpu.dot_dimension_numbers<[1], [0], [0], [1], [0, 0, 1, 1], [], []>} : vector<16x128xbf16>, vector<128x128xbf16>, vector<16x128xf32> -> vector<16x128xf32>
    %c0_15 = arith.constant 0 : index
    %c0_16 = arith.constant 0 : index
    %19 = vector.load %arg7[%c0_15, %c0_16] : memref<1x128xf32, #tpu.memory_space<vmem>>, vector<1x128xf32>
    %20 = vector.broadcast %19 : vector<1x128xf32> to vector<16x128xf32>
    %21 = arith.addf %18, %20 : vector<16x128xf32>
    %cst_17 = arith.constant dense<0xFF800000> : vector<16xf32>
    %22 = vector.multi_reduction <maximumf>, %21, %cst_17 [1] : vector<16x128xf32> to vector<16xf32>
    %23 = vector.shape_cast %22 : vector<16xf32> to vector<16x1xf32>
    %24 = vector.broadcast %23 : vector<16x1xf32> to vector<16x128xf32>
    %25 = arith.subf %21, %24 : vector<16x128xf32>
    %26 = math.exp %25 : vector<16x128xf32>
    %27 = arith.truncf %26 : vector<16x128xf32> to vector<16x128xbf16>
    %c0_18 = arith.constant 0 : index
    %c0_19 = arith.constant 0 : index
    %28 = vector.load %arg8[%c0_18, %c0_19] : memref<128x128xbf16, #tpu.memory_space<vmem>>, vector<128x128xbf16>
    %cst_20 = arith.constant dense<0.000000e+00> : vector<16x128xf32>
    %29 = tpu.matmul %27, %28, %cst_20 {dimension_numbers = #tpu.dot_dimension_numbers<[1], [0], [0], [1], [0, 0, 1, 1], [], []>} : vector<16x128xbf16>, vector<128x128xbf16>, vector<16x128xf32> -> vector<16x128xf32>
    %30 = tpu.reciprocal %29 {approx = true} : vector<16x128xf32> -> vector<16x128xf32>
    %31 = arith.mulf %26, %30 : vector<16x128xf32>
    %c0_21 = arith.constant 0 : index
    %c0_22 = arith.constant 0 : index
    %32 = vector.load %arg9[%c0_21, %c0_22] : memref<16x128xf32, #tpu.memory_space<vmem>>, vector<16x128xf32>
    tpu.vector_store %arg9[%c0_21, %c0_22], %31 {strides = array<i32>} : memref<16x128xf32, #tpu.memory_space<vmem>>, vector<16x128xf32>,
    return
  }
  func.func @transform_0(%arg0: i32) -> (i32, i32) {
    %c0_i32 = arith.constant 0 : i32
    %c0_i32_0 = arith.constant 0 : i32
    return %arg0, %c0_i32 : i32, i32
  }
  func.func @transform_1(%arg0: i32) -> (i32, i32) {
    %c0_i32 = arith.constant 0 : i32
    %c0_i32_0 = arith.constant 0 : i32
    %c0_i32_1 = arith.constant 0 : i32
    return %c0_i32, %c0_i32_0 : i32, i32
  }
  func.func @transform_2(%arg0: i32) -> (i32, i32) {
    %c0_i32 = arith.constant 0 : i32
    %c0_i32_0 = arith.constant 0 : i32
    %c0_i32_1 = arith.constant 0 : i32
    return %c0_i32, %c0_i32_0 : i32, i32
  }
  func.func @transform_3(%arg0: i32) -> (i32, i32) {
    %c0_i32 = arith.constant 0 : i32
    %c0_i32_0 = arith.constant 0 : i32
    %c0_i32_1 = arith.constant 0 : i32
    return %c0_i32, %c0_i32_0 : i32, i32
  }
  func.func @transform_4(%arg0: i32) -> (i32, i32) {
    %c0_i32 = arith.constant 0 : i32
    %c0_i32_0 = arith.constant 0 : i32
    %c0_i32_1 = arith.constant 0 : i32
    return %c0_i32, %c0_i32_0 : i32, i32
  }
  func.func @transform_5(%arg0: i32) -> (i32, i32) {
    %c0_i32 = arith.constant 0 : i32
    %c0_i32_0 = arith.constant 0 : i32
    %c0_i32_1 = arith.constant 0 : i32
    return %c0_i32, %c0_i32_0 : i32, i32
  }
  func.func @transform_6(%arg0: i32) -> (i32, i32) {
    %c0_i32 = arith.constant 0 : i32
    %c0_i32_0 = arith.constant 0 : i32
    %c0_i32_1 = arith.constant 0 : i32
    return %c0_i32, %c0_i32_0 : i32, i32
  }
  func.func @transform_7(%arg0: i32) -> (i32, i32) {
    %c0_i32 = arith.constant 0 : i32
    %c0_i32_0 = arith.constant 0 : i32
    %c0_i32_1 = arith.constant 0 : i32
    return %c0_i32, %c0_i32_0 : i32, i32
  }
  func.func @transform_8(%arg0: i32) -> (i32, i32) {
    %c0_i32 = arith.constant 0 : i32
    %c0_i32_0 = arith.constant 0 : i32
    return %arg0, %c0_i32 : i32, i32
  }
}

</mosaic_0001>

<bundles_post_ra>
// kernel: tpu_custom_call.1
= control target key start
LH: loop header
LB: loop body
LE: loop exit
PB: predicated region body
PF: predicated region fallthrough
CT: control target
= control target key end

     0   :  { %13 = vsyncpa [#allocation3], 0  ;;  %s1062_s0 = inlined_call_operand.hbm [shape: bf16[16,32], index: 0, kind: input, shape index: {}]   ;;  %s1063_s1 = inlined_call_operand.hbm [shape: bf16[32,128], index: 1, kind: input, shape index: {}]   ;;  %s1064_s2 = inlined_call_operand.vmem [shape: f32[1,128], index: 2, kind: input, shape index: {}]   ;;  %s1065_s3 = inlined_call_operand.hbm [shape: bf16[128,128], index: 3, kind: input, shape index: {}]   ;;  %s1066_s4 = inlined_call_operand.vmem [shape: f32[1,128], index: 4, kind: input, shape index: {}]   ;;  %s1067_s5 = inlined_call_operand.hbm [shape: bf16[128,128], index: 5, kind: input, shape index: {}]   ;;  %s1068_s6 = inlined_call_operand.vmem [shape: f32[1,128], index: 6, kind: input, shape index: {}]   ;;  %s1069_s7 = inlined_call_operand.hbm [shape: bf16[128,128], index: 7, kind: input, shape index: {}]   ;;  %s1070_s8 = inlined_call_operand.hbm [shape: f32[16,128], index: 8, kind: output, shape index: {}]  }
   0x1   :  { %14 = vsyncpa [#allocation6], 0 }
   0x2   :  { %15 = vsyncpa [#allocation9], 0 }
   0x3   :  { %16 = vsyncpa [#allocation4], 0  ;;  %s861_s27 = smov [#allocation5]   ;;  %s862_s29 = smov [#allocation8]  }
   0x4   :  { %s34_s28 = sshll.u32 %s861_s27, 4  ;;  %s62_s30 = sshll.u32 %s862_s29, 4  ;;  %s35_s28 = int_to_ptr.vmem [resolvable:$true] %s34_s28  ;;  %s918_s30 = int_to_ptr.vmem [resolvable:$true] %s62_s30 }
   0x5   :  { %s721_s11 = scalar_lea.hbm %s1063_s1, 256 }
   0x6   :  { %p722_p0 = scmp.ne.s32.totalorder %s1063_s1, %s721_s11  ;;  %p725_p1 = scmp.lt.u32.totalorder %s721_s11, %s1063_s1 }
   0x8   :  { %p727_p2 = pnand %p725_p1, %p722_p0 }
   0xa   :  { %730 = shalt.err (!%p727_p2)
}
   0xb   :  { %s731_s16 = scalar_lea.vmem %s35_s28, 256  ;;  %p736_p4 = scmp.lt.s32.totalorder %s35_s28, %s35_s28 }
   0xc   :  { %p732_p3 = scmp.ne.s32.totalorder %s35_s28, %s731_s16  ;;  %p737_p5 = scmp.lt.s32.totalorder %s731_s16, %s731_s16 }
   0xe   :  { %p738_p6 = por %p737_p5, %p736_p4 }
  0x10   :  { %p739_p7 = pnand %p738_p6, %p732_p3 }
  0x12   :  { %742 = shalt.err (!%p739_p7)
}
  0x13   :  { %s863_s17 = smov 64   ;;  %s864_s18 = smov 4  }
  0x14   :  { %40 = dma.hbm_to_vmem [thread:$0]  %s1063_s1, 256, %s35_s28, [#allocation6], %s863_s17, %s863_s17, %s864_s18  }
  0x15   :  { %s743_s23 = scalar_lea.hbm %s1067_s5, 1024 }
  0x16   :  { %p744_p8 = scmp.ne.s32.totalorder %s1067_s5, %s743_s23  ;;  %p747_p9 = scmp.lt.u32.totalorder %s743_s23, %s1067_s5 }
  0x18   :  { %p749_p10 = pnand %p747_p9, %p744_p8 }
  0x1a   :  { %752 = shalt.err (!%p749_p10)
}
  0x1b   :  { %s753_s29 = scalar_lea.vmem %s918_s30, 1024  ;;  %p758_p12 = scmp.lt.s32.totalorder %s918_s30, %s918_s30 }
  0x1c   :  { %p754_p11 = scmp.ne.s32.totalorder %s918_s30, %s753_s29  ;;  %p759_p13 = scmp.lt.s32.totalorder %s753_s29, %s753_s29 }
  0x1e   :  { %p760_p0 = por %p759_p13, %p758_p12 }
  0x20   :  { %p761_p1 = pnand %p760_p0, %p754_p11 }
  0x22   :  { %764 = shalt.err (!%p761_p1)
}
  0x23   :  { %68 = dma.hbm_to_vmem [thread:$0]  %s1067_s5, 1024, %s918_s30, [#allocation9], %s863_s17, %s863_s17, %s864_s18  }
  0x24   :  { %s865_s9 = smov [#allocation2]   ;;  %s866_s11 = smov [#allocation7]  }
  0x25   :  { %s22_s10 = sshll.u32 %s865_s9, 4  ;;  %s48_s12 = sshll.u32 %s866_s11, 4  ;;  %s23_s10 = int_to_ptr.vmem [resolvable:$true] %s22_s10  ;;  %s955_s12 = int_to_ptr.vmem [resolvable:$true] %s48_s12 }
  0x26   :  { %s765_s15 = scalar_lea.hbm %s1062_s0, 128 }
  0x27   :  { %p766_p2 = scmp.ne.s32.totalorder %s1062_s0, %s765_s15  ;;  %p769_p3 = scmp.lt.u32.totalorder %s765_s15, %s1062_s0 }
  0x29   :  { %p771_p4 = pnand %p769_p3, %p766_p2 }
  0x2b   :  { %774 = shalt.err (!%p771_p4)
}
  0x2c   :  { %s775_s5 = scalar_lea.vmem %s23_s10, 128  ;;  %p780_p6 = scmp.lt.s32.totalorder %s23_s10, %s23_s10 }
  0x2d   :  { %p776_p5 = scmp.ne.s32.totalorder %s23_s10, %s775_s5  ;;  %p781_p7 = scmp.lt.s32.totalorder %s775_s5, %s775_s5 }
  0x2f   :  { %p782_p8 = por %p781_p7, %p780_p6 }
  0x31   :  { %p783_p9 = pnand %p782_p8, %p776_p5 }
  0x33   :  { %786 = shalt.err (!%p783_p9)
}
  0x34   :  { %28 = dma.hbm_to_vmem [thread:$0]  %s1062_s0, 128, %s23_s10, [#allocation3], %s863_s17, %s863_s17, %s864_s18  }
  0x35   :  { %s787_s25 = scalar_lea.hbm %s1065_s3, 1024 }
  0x36   :  { %p788_p10 = scmp.ne.s32.totalorder %s1065_s3, %s787_s25  ;;  %p791_p11 = scmp.lt.u32.totalorder %s787_s25, %s1065_s3 }
  0x38   :  { %p793_p12 = pnand %p791_p11, %p788_p10 }
  0x3a   :  { %796 = shalt.err (!%p793_p12)
}
  0x3b   :  { %s797_s28 = scalar_lea.vmem %s955_s12, 1024  ;;  %p802_p0 = scmp.lt.s32.totalorder %s955_s12, %s955_s12 }
  0x3c   :  { %p798_p13 = scmp.ne.s32.totalorder %s955_s12, %s797_s28  ;;  %p803_p1 = scmp.lt.s32.totalorder %s797_s28, %s797_s28 }
  0x3e   :  { %p804_p2 = por %p803_p1, %p802_p0 }
  0x40   :  { %p805_p3 = pnand %p804_p2, %p798_p13 }
  0x42   :  { %808 = shalt.err (!%p805_p3)
}
  0x43   :  { %54 = dma.hbm_to_vmem [thread:$0]  %s1065_s3, 1024, %s955_s12, [#allocation6], %s863_s17, %s863_s17, %s864_s18  }
  0x44   :  { %s867_s10 = smov [#allocation10]   ;;  %s809_s15 = scalar_lea.hbm %s1069_s7, 1024 }
  0x45   :  { %s76_s11 = sshll.u32 %s867_s10, 4  ;;  %p810_p4 = scmp.ne.s32.totalorder %s1069_s7, %s809_s15  ;;  %s77_s11 = int_to_ptr.vmem [resolvable:$true] %s76_s11 }
  0x46   :  { %p813_p5 = scmp.lt.u32.totalorder %s809_s15, %s1069_s7 }
  0x48   :  { %p815_p6 = pnand %p813_p5, %p810_p4 }
  0x4a   :  { %818 = shalt.err (!%p815_p6)
}
  0x4b   :  { %s819_s5 = scalar_lea.vmem %s77_s11, 1024  ;;  %p824_p8 = scmp.lt.s32.totalorder %s77_s11, %s77_s11 }
  0x4c   :  { %p820_p7 = scmp.ne.s32.totalorder %s77_s11, %s819_s5  ;;  %p825_p9 = scmp.lt.s32.totalorder %s819_s5, %s819_s5 }
  0x4e   :  { %p826_p10 = por %p825_p9, %p824_p8 }
  0x50   :  { %p827_p11 = pnand %p826_p10, %p820_p7 }
  0x52   :  { %830 = shalt.err (!%p827_p11)
}
  0x53   :  { %82 = dma.hbm_to_vmem [thread:$0]  %s1069_s7, 1024, %s77_s11, [#allocation9], %s863_s17, %s863_s17, %s864_s18  }
  0x54   :  { %853 = dma.done.wait [#allocation3], 128  }
  0x55   :  { %854 = vsyncadd [#allocation3], 4294967168 }
  0x56   :  { %855 = dma.done.wait [#allocation6], 1280  }
  0x57   :  { %856 = vsyncadd [#allocation6], 4294966016 }
  0x58   :  { %857 = dma.done.wait [#allocation9], 2048  }
  0x59   :  { %858 = vsyncadd [#allocation9], 4294965248  ;;  %v868_v0 = vmov 0.0   ;;  %vm869_vm0 = vmmov 0   ;;  %v686_v1 = vld [vmem:[#allocation5] sm:$0xff]   ;;  %v687_v2 = vld [vmem:[#allocation5 + $0x8] sm:$0xff]  }
  0x5a   :  { %606 = vmatprep.subr.bf16.mxu0 %v868_v0  ;;  %610 = vmatprep.mubr.msk.bf16.mxu0 %vm869_vm0, %v868_v0  ;;  %v689_v3 = vld [vmem:[#allocation7] sm:$0xff]   ;;  %v688_v4 = vld [vmem:[#allocation2] sm:$0xff]   ;;  %vm129_vm1 = vcmask 261120   ;;  %v691_v6 = vld [vmem:[#allocation7 + $0x10] sm:$0xff]  }
  0x5b   :  { %614 = vmatprep.subr.bf16.mxu1 %v868_v0  ;;  %630 = vmatprep.mubr.msk.bf16.mxu1 %vm869_vm0, %v868_v0  ;;  %v690_v5 = vld [vmem:[#allocation7 + $0x8] sm:$0xff]   ;;  %v692_v7 = vld [vmem:[#allocation7 + $0x18] sm:$0xff]   ;;  %v693_v8 = vld [vmem:[#allocation7 + $0x20] sm:$0xff]  }
  0x5c   :  { %607 = vmatpush3.bf16.msra.mxu0 %v686_v1  ;;  %615 = vmatpush3.bf16.msra.mxu1 %v689_v3  ;;  %v694_v9 = vld [vmem:[#allocation7 + $0x28] sm:$0xff]   ;;  %v695_v10 = vld [vmem:[#allocation7 + $0x30] sm:$0xff]   ;;  %v696_v11 = vld [vmem:[#allocation7 + $0x38] sm:$0xff]  }
  0x5d   :  { %608 = vmatprep.subr.bf16.mxu0 %v868_v0  ;;  %616 = vmatprep.subr.bf16.mxu1 %v868_v0  ;;  %v697_v12 = vld [vmem:[#allocation8] sm:$0xff]   ;;  %v698_v13 = vld [vmem:[#allocation8 + $0x8] sm:$0xff]   ;;  %v699_v14 = vld [vmem:[#allocation8 + $0x10] sm:$0xff]  }
  0x5e   :  { %v700_v15 = vld [vmem:[#allocation8 + $0x18] sm:$0xff]   ;;  %v701_v16 = vld [vmem:[#allocation8 + $0x20] sm:$0xff]   ;;  %v702_v17 = vld [vmem:[#allocation8 + $0x28] sm:$0xff]  }
  0x5f   :  { %v545_v18 = vld [vmem:[%s1064_s2] ss:$0 sm:$0xff]  ;;  %v703_v28 = vld [vmem:[#allocation8 + $0x30] sm:$0xff]   ;;  %v704_v29 = vld [vmem:[#allocation8 + $0x38] sm:$0xff]  }
  0x60   :  { %609 = vmatpush3.bf16.msra.mxu0 %v687_v2  ;;  %617 = vmatpush3.bf16.msra.mxu1 %v690_v5  ;;  %v550_v30 = vld [vmem:[%s1066_s4] ss:$0 sm:$0xff]  ;;  %v705_v40 = vld [vmem:[#allocation10] sm:$0xff]   ;;  %v707_v42 = vld [vmem:[#allocation10 + $0x10] sm:$0xff]  }
  0x61   :  { %634 = vmatprep.subr.bf16.mxu0 %v868_v0  ;;  %618 = vmatprep.subr.bf16.mxu1 %v868_v0  ;;  %v706_v41 = vld [vmem:[#allocation10 + $0x8] sm:$0xff]   ;;  %v708_v50 = vld [vmem:[#allocation10 + $0x18] sm:$0xff]   ;;  %v709_v51 = vld [vmem:[#allocation10 + $0x20] sm:$0xff]  }
  0x62   :  { %v559_v43 = vld [vmem:[%s1068_s6] ss:$0 sm:$0xff]  ;;  %v711_v53 = vld [vmem:[#allocation10 + $0x30] sm:$0xff]   ;;  %v712_v54 = vld [vmem:[#allocation10 + $0x38] sm:$0xff]   ;;  %s870_s6 = smov [#allocation11]  }
  0x63   :  { %611 = vmatmul.mubr.msk.bf16.vlgmr.msra.gmra.mrb[0].mxu0 %vm129_vm1, %v688_v4  ;;  %v710_v52 = vld [vmem:[#allocation10 + $0x28] sm:$0xff]   ;;  %s531_s22 = sshll.u32 %s870_s6, 4  ;;  %s532_s22 = int_to_ptr.vmem [resolvable:$true] %s531_s22 }
  0x64   :  { %650 = vmatprep.mubr.msk.bf16.mxu0 %vm869_vm0, %v868_v0  ;;  %619 = vmatpush3.bf16.msra.mxu1 %v691_v6  ;;  %s831_s23 = scalar_lea.vmem %s532_s22, 256  ;;  %p836_p13 = scmp.lt.s32.totalorder %s532_s22, %s532_s22 }
  0x65   :  { %620 = vmatprep.subr.bf16.mxu1 %v868_v0  ;;  %635 = vmatpush3.bf16.msra.mxu0 %v697_v12  ;;  %p832_p12 = scmp.ne.s32.totalorder %s532_s22, %s831_s23  ;;  %p837_p0 = scmp.lt.s32.totalorder %s831_s23, %s831_s23 }
  0x66   :  { %636 = vmatprep.subr.bf16.mxu0 %v868_v0 }
  0x67   :  { %p838_p1 = por %p837_p0, %p836_p13 }
  0x68   :  { %621 = vmatpush3.bf16.msra.mxu1 %v692_v7 }
  0x69   :  { %622 = vmatprep.subr.bf16.mxu1 %v868_v0  ;;  %637 = vmatpush3.bf16.msra.mxu0 %v698_v13  ;;  %p839_p2 = pnand %p838_p1, %p832_p12 }
  0x6a   :  { %638 = vmatprep.subr.bf16.mxu0 %v868_v0 }
  0x6c   :  { %623 = vmatpush3.bf16.msra.mxu1 %v693_v8 }
  0x6d   :  { %624 = vmatprep.subr.bf16.mxu1 %v868_v0  ;;  %639 = vmatpush3.bf16.msra.mxu0 %v699_v14 }
  0x6e   :  { %640 = vmatprep.subr.bf16.mxu0 %v868_v0 }
  0x70   :  { %625 = vmatpush3.bf16.msra.mxu1 %v694_v9 }
  0x71   :  { %626 = vmatprep.subr.bf16.mxu1 %v868_v0  ;;  %641 = vmatpush3.bf16.msra.mxu0 %v700_v15 }
  0x72   :  { %642 = vmatprep.subr.bf16.mxu0 %v868_v0 }
  0x74   :  { %627 = vmatpush3.bf16.msra.mxu1 %v695_v10 }
  0x75   :  { %628 = vmatprep.subr.bf16.mxu1 %v868_v0  ;;  %643 = vmatpush3.bf16.msra.mxu0 %v701_v16 }
  0x76   :  { %644 = vmatprep.subr.bf16.mxu0 %v868_v0 }
  0x78   :  { %629 = vmatpush3.bf16.msra.mxu1 %v696_v11 }
  0x79   :  { %654 = vmatprep.subr.bf16.mxu1 %v868_v0  ;;  %645 = vmatpush3.bf16.msra.mxu0 %v702_v17 }
  0x7a   :  { %646 = vmatprep.subr.bf16.mxu0 %v868_v0 }
  0x7d   :  { %647 = vmatpush3.bf16.msra.mxu0 %v703_v28 }
  0x7e   :  { %648 = vmatprep.subr.bf16.mxu0 %v868_v0 }
  0x81   :  { %649 = vmatpush3.bf16.msra.mxu0 %v704_v29 }
 0x136   :  { %v167_v19 = vpop.f32.mrb[0].mxu0 }
 0x137   :  { %v168_v20 = vadd.f32 %v545_v18, %v167_v19  ;;  %v612_v21 = vpop.f32.mrb[1].mxu0 }
 0x138   :  { %v170_v22 = vpop.f32.mrb[2].mxu0 }
 0x139   :  { %v171_v23 = vadd.f32 %v545_v18, %v170_v22  ;;  %v613_v24 = vpop.f32.mrb[3].mxu0  ;;  %v174_v25 = vmax.f32 %v168_v20, 0.0 }
 0x13b   :  { %v175_v26 = vmax.f32 %v171_v23, 0.0 }
 0x13d   :  { %v176_v27 = vpack.c.bf16 %v175_v26, %v174_v25 }
 0x13f   :  { %631 = vmatmul.mubr.bf16.vlgmr.msra.gmra.mrb[0].mxu1 %v176_v27 }
 0x140   :  { %670 = vmatprep.mubr.msk.bf16.mxu1 %vm869_vm0, %v868_v0  ;;  %655 = vmatpush3.bf16.msra.mxu1 %v705_v40 }
 0x141   :  { %656 = vmatprep.subr.bf16.mxu1 %v868_v0 }
 0x144   :  { %657 = vmatpush3.bf16.msra.mxu1 %v706_v41 }
 0x145   :  { %658 = vmatprep.subr.bf16.mxu1 %v868_v0 }
 0x148   :  { %659 = vmatpush3.bf16.msra.mxu1 %v707_v42 }
 0x149   :  { %660 = vmatprep.subr.bf16.mxu1 %v868_v0 }
 0x14c   :  { %661 = vmatpush3.bf16.msra.mxu1 %v708_v50 }
 0x14d   :  { %662 = vmatprep.subr.bf16.mxu1 %v868_v0 }
 0x150   :  { %663 = vmatpush3.bf16.msra.mxu1 %v709_v51 }
 0x151   :  { %664 = vmatprep.subr.bf16.mxu1 %v868_v0 }
 0x154   :  { %665 = vmatpush3.bf16.msra.mxu1 %v710_v52 }
 0x155   :  { %666 = vmatprep.subr.bf16.mxu1 %v868_v0 }
 0x158   :  { %667 = vmatpush3.bf16.msra.mxu1 %v711_v53 }
 0x159   :  { %668 = vmatprep.subr.bf16.mxu1 %v868_v0 }
 0x15c   :  { %669 = vmatpush3.bf16.msra.mxu1 %v712_v54 }
 0x212   :  { %v282_v31 = vpop.f32.mrb[0].mxu1 }
 0x213   :  { %v283_v32 = vadd.f32 %v550_v30, %v282_v31  ;;  %v632_v33 = vpop.f32.mrb[1].mxu1 }
 0x214   :  { %v285_v34 = vpop.f32.mrb[2].mxu1 }
 0x215   :  { %v286_v35 = vadd.f32 %v550_v30, %v285_v34  ;;  %v633_v36 = vpop.f32.mrb[3].mxu1  ;;  %v289_v37 = vmax.f32 %v283_v32, 0.0 }
 0x217   :  { %v290_v38 = vmax.f32 %v286_v35, 0.0 }
 0x219   :  { %v291_v39 = vpack.c.bf16 %v290_v38, %v289_v37 }
 0x21b   :  { %651 = vmatmul.mubr.bf16.vlgmr.msra.gmra.mrb[4].mxu0 %v291_v39 }
 0x2ee   :  { %v397_v44 = vpop.f32.mrb[4].mxu0 }
 0x2ef   :  { %v398_v45 = vadd.f32 %v559_v43, %v397_v44  ;;  %v652_v46 = vpop.f32.mrb[5].mxu0 }
 0x2f0   :  { %v400_v47 = vpop.f32.mrb[6].mxu0 }
 0x2f1   :  { %404 = vmax.xlane.f32.xlu0 %v398_v45  ;;  %v653_v48 = vpop.f32.mrb[7].mxu0  ;;  %v401_v49 = vadd.f32 %v559_v43, %v400_v47 }
 0x2f5   :  { %406 = vmax.xlane.f32.xlu0 %v401_v49 }
 0x37e   :  { %v405_v55 = vpop.xlane.xlu0 %404 }
 0x37f   :  { %v408_v56 = vsub.f32 %v398_v45, %v405_v55 }
 0x381   :  { %v410_v57 = vmul.f32 1.442695, %v408_v56 }
 0x382   :  { %v407_v58 = vpop.xlane.xlu0 %406 }
 0x383   :  { %v409_v59 = vsub.f32 %v401_v49, %v407_v58  ;;  %713 = vpow2.f32 %v410_v57 }
 0x385   :  { %v412_v60 = vmul.f32 1.442695, %v409_v59 }
 0x387   :  { %715 = vpow2.f32 %v412_v60 }
 0x38d   :  { %v714_v61 = vpop.eup %713 }
 0x391   :  { %v716_v62 = vpop.eup %715 }
 0x392   :  { %v414_v63 = vpack.c.bf16 %v716_v62, %v714_v61 }
 0x394   :  { %671 = vmatmul.mubr.bf16.vlgmr.msra.gmra.mrb[4].mxu1 %v414_v63 }
 0x467   :  { %v513_v1 = vpop.f32.mrb[4].mxu1 }
 0x468   :  { %717 = vrcp.f32 %v513_v1  ;;  %v672_v2 = vpop.f32.mrb[5].mxu1 }
 0x469   :  { %v516_v3 = vpop.f32.mrb[6].mxu1 }
 0x46a   :  { %719 = vrcp.f32 %v516_v3  ;;  %v673_v4 = vpop.f32.mrb[7].mxu1 }
 0x472   :  { %v718_v0 = vpop.eup %717 }
 0x473   :  { %v522_v5 = vmul.f32 %v718_v0, %v714_v61 }
 0x474   :  { %v720_v6 = vpop.eup %719 }
 0x475   :  { %v523_v7 = vmul.f32 %v720_v6, %v716_v62  ;;  %524 = vst [vmem:[#allocation11] sm:$0xff] %v522_v5 }
 0x477   :  { %525 = vst [vmem:[#allocation11 + $0x8] sm:$0xff] %v523_v7 }
 0x478   :  { %842 = shalt.err (!%p839_p2)
}
 0x479   :  { %s843_s26 = scalar_lea.hbm %s1070_s8, 256 }
 0x47a   :  { %p844_p3 = scmp.ne.s32.totalorder %s1070_s8, %s843_s26  ;;  %p847_p4 = scmp.lt.u32.totalorder %s843_s26, %s1070_s8 }
 0x47c   :  { %p849_p5 = pnand %p847_p4, %p844_p3 }
 0x47e   :  { %852 = shalt.err (!%p849_p5)
}
 0x47f   :  { %s871_s0 = smov 128   ;;  %s872_s9 = smov 8  }
 0x480   :  { %537 = dma.vmem_to_hbm [thread:$0]  %s532_s22, 256, %s1070_s8, [#allocation4], %s871_s0, %s871_s0, %s872_s9  }
 0x481   :  { %859 = dma.done.wait [#allocation4], 256  }
 0x482   :  { %860 = vsyncadd [#allocation4], 4294967040 }
 0x483   :  { %541 = vsyncpa [#allocation3], 1 }
 0x484   :  { %542 = vsyncpa [#allocation6], 1 }
 0x485   :  { %543 = vsyncpa [#allocation9], 1 }
 0x486   :  { %544 = vsyncpa [#allocation4], 1 }

</bundles_post_ra>
